<compile_context>
chip_gen: v5e
topology: v5e:2x2
jax: 0.10.0
libtpu: 0.0.40
codegen_flags: <defaults>
</compile_context>

<pallas_src>
import math

import jax
import jax.numpy as jnp
from jax import lax
from jax.experimental import pallas as pl
from jax.experimental.pallas import tpu as pltpu


def _cdiv(a, b):
    return -(-a // b)


def _round_up(x, m):
    return _cdiv(x, m) * m


def _sublane_pack(dtype):
    """Rows packed per 32-bit sublane: f32 -> 8, bf16 -> 16, int8/fp8 -> 32."""
    return 8 * max(1, 4 // jnp.dtype(dtype).itemsize)


def _vmem_info():
    """Returns (budget we plan against, physical per-core VMEM bytes)."""
    phys = 64 * 2 ** 20                      # conservative default: v7x per-TC VMEM
    try:
        info = pltpu.get_tpu_info()
        phys = int(getattr(info, "vmem_capacity_bytes", phys) or phys)
    except Exception:
        pass
    cap = min(phys * 3 // 4, 100 * 2 ** 20)  # ~48 MiB on v7x, ~96 MiB on v5e/v6e
    return cap, phys


# ----------------------------- kernels --------------------------------------
def _be_matmul_kernel(x_ref, w_ref, b_ref, o_ref):
    # x_ref: (TM, KC_pad)        im2col rows for one (model, row-tile)
    # w_ref: (KC_pad, C_out_pad) effective weight for this model
    # b_ref: (1, C_out_pad)      f32 bias for this model
    # o_ref: (TM, C_out_pad)
    acc = jnp.dot(x_ref[...], w_ref[...], preferred_element_type=jnp.float32)
    o_ref[...] = (acc + b_ref[...]).astype(o_ref.dtype)


def _be_matmul_split_kernel(x_ref, w_ref, b_ref, o_ref, acc_ref):
    # Contraction-split variant: grid axis 2 walks KC blocks (last, "arbitrary").
    k = pl.program_id(2)

    @pl.when(k == 0)
    def _():
        acc_ref[...] = jnp.zeros_like(acc_ref)

    acc_ref[...] += jnp.dot(x_ref[...], w_ref[...],
                            preferred_element_type=jnp.float32)

    @pl.when(k == pl.num_programs(2) - 1)
    def _():
        o_ref[...] = (acc_ref[...] + b_ref[...]).astype(o_ref.dtype)


# ----------------------------- wrapper ---------------------------------------
def batch_ensemble_conv1d(x, alpha, gamma, bias, weight, *, num_models,
                          stride=1, padding=0, row_tile=None, kc_block=None,
                          compute_dtype=None):
    """x: (B, C_in, W); ensemble members stacked along batch (model = b // E)."""
    B, C_in, W = x.shape
    M = num_models
    assert B % M == 0, "batch must be divisible by num_models"
    E = B // M
    C_out, C_in_w, K = weight.shape
    assert C_in_w == C_in
    W_p = W + 2 * padding
    W_out = (W_p - K) // stride + 1

    out_dtype = x.dtype
    # NOTE: downcasting to bf16 (compute_dtype) halves x2col HBM bytes and uses
    # the bf16 MXU peak, at the cost of one extra rounding vs. the PyTorch order.
    cdtype = jnp.dtype(compute_dtype) if compute_dtype is not None else jnp.dtype(x.dtype)
    itemsize = cdtype.itemsize
    sub = _sublane_pack(cdtype)

    # ---------------- static tiling decisions -------------------------------
    KC = K * C_in
    # Lane-dense output stores; 256-align only when plausibly MXU-bound.
    cout_align = 256 if (itemsize <= 2 and C_out >= 512) else 128
    C_out_pad = _round_up(C_out, cout_align)

    R = E * W_out                                   # rows per ensemble member
    vmem_cap, vmem_phys = _vmem_info()
    if row_tile is None:
        # v5e / v6e (128 MiB VMEM) can afford 1024-row tiles; v7x (64 MiB) cannot.
        row_tile = 1024 if vmem_phys >= 96 * 2 ** 20 else 512
    n_row = max(1, _cdiv(R, row_tile))
    TM = min(_round_up(row_tile, sub), _round_up(_cdiv(R, n_row), sub))
    R_pad = n_row * TM

    # Contraction padding: sublane-only when small (full-dim BlockSpec extent
    # is legal), 128 when KC is already large.
    kc_align = 128 if KC >= 512 else sub
    KC_pad = _round_up(KC, kc_align)

    HEADROOM = 4 * 2 ** 20

    def _need(tm, tk, with_acc):
        n = (2 * tm * tk * itemsize              # x tile, double buffered
             + 2 * tk * C_out_pad * itemsize     # weight tile (conservative 2 bufs)
             + 2 * tm * C_out_pad * itemsize     # output tile, double buffered
             + 2 * C_out_pad * 4)                # f32 bias
        if with_acc:
            n += tm * C_out_pad * 4              # f32 accumulator scratch
        return n

    split = (kc_block is not None) or (_need(TM, KC_pad, False) + HEADROOM > vmem_cap)
    if split:
        KC_pad = _round_up(KC, 128)              # clean 128-multiple KC tiles
        if kc_block is not None:
            tk = _round_up(int(kc_block), 128)
        else:
            tk = max(128, min(KC_pad, 2048))
            while tk > 128 and _need(TM, tk, True) + HEADROOM > vmem_cap:
                tk -= 128
            while TM > sub and _need(TM, tk, True) + HEADROOM > vmem_cap:
                TM = _round_up(TM // 2, sub)
        tk = min(tk, KC_pad)
        nk = _cdiv(KC_pad, tk)
        KC_pad = nk * tk
        n_row = _cdiv(R, TM)
        R_pad = n_row * TM
    else:
        tk, nk = KC_pad, 1

    need = _need(TM, tk, split)
    # Track the real need (+ headroom) instead of silently clamping; never ask
    # beyond physical VMEM.
    vmem_limit = int(min(max(need + HEADROOM, 16 * 2 ** 20), vmem_phys))

    # ---------------- wrapper-side layout prep (one im2col materialization) --
    x_nwc = jnp.transpose(x, (0, 2, 1)).astype(cdtype)           # (B, W, C_in)
    if padding:
        x_nwc = jnp.pad(x_nwc, ((0, 0), (padding, padding), (0, 0)))
    # TODO(synk): for mem-bound v5e configs with C_in >= 128, replace wrapper
    # im2col with in-kernel K-tap accumulation over a haloed x block (avoids
    # the K-fold HBM expansion entirely).
    cols = jnp.stack(
        [lax.slice(x_nwc, (0, k, 0),
                   (B, k + (W_out - 1) * stride + 1, C_in),
                   (1, stride, 1))
         for k in range(K)],
        axis=2)                                                   # (B, W_out, K, C_in)
    x2col = cols.reshape(M, R, KC)
    if R_pad != R or KC_pad != KC:
        x2col = jnp.pad(x2col, ((0, 0), (0, R_pad - R), (0, KC_pad - KC)))

    # Per-model effective weight: alpha (input scale) and gamma (output scale)
    # folded in.  (C_out, C_in, K) -> (M, K*C_in, C_out).
    # TODO(synk): for large num_models / weights, keep one shared weight and
    # apply alpha/gamma in the kernel instead of materializing M copies.
    w_t = jnp.transpose(weight, (2, 1, 0)).astype(jnp.float32)    # (K, C_in, C_out)
    w_eff = (w_t[None]
             * alpha.astype(jnp.float32)[:, None, :, None]
             * gamma.astype(jnp.float32)[:, None, None, :])       # (M, K, C_in, C_out)
    w_eff = w_eff.reshape(M, KC, C_out).astype(cdtype)
    if KC_pad != KC or C_out_pad != C_out:
        w_eff = jnp.pad(w_eff, ((0, 0), (0, KC_pad - KC), (0, C_out_pad - C_out)))

    if bias is None:
        bias = jnp.zeros((M, C_out), jnp.float32)
    bias_p = bias.astype(jnp.float32)
    if C_out_pad != C_out:
        bias_p = jnp.pad(bias_p, ((0, 0), (0, C_out_pad - C_out)))
    bias_p = bias_p.reshape(M, 1, C_out_pad)

    # ---------------- Pallas call --------------------------------------------
    def _call(single_buffer_params):
        def spec(shape, index_map, buffers=None):
            if single_buffer_params and buffers is not None:
                try:
                    return pl.BlockSpec(shape, index_map,
                                        pipeline_mode=pl.Buffered(buffers))
                except TypeError:       # Pallas build without pipeline_mode
                    pass
            return pl.BlockSpec(shape, index_map)

        if not split:
            return pl.pallas_call(
                _be_matmul_kernel,
                out_shape=jax.ShapeDtypeStruct((M, R_pad, C_out_pad), out_dtype),
                grid=(M, n_row),
                in_specs=[
                    pl.BlockSpec((None, TM, KC_pad), lambda m, r: (m, r, 0)),
                    # Weight / bias only change with the model index: DMAs are
                    # skipped along the inner row axis; one buffer is enough.
                    spec((None, KC_pad, C_out_pad), lambda m, r: (m, 0, 0),
                         buffers=1),
                    spec((None, 1, C_out_pad), lambda m, r: (m, 0, 0),
                         buffers=1),
                ],
                out_specs=pl.BlockSpec((None, TM, C_out_pad),
                                       lambda m, r: (m, r, 0)),
                compiler_params=pltpu.CompilerParams(
                    dimension_semantics=("parallel", "parallel"),
                    vmem_limit_bytes=vmem_limit),
            )(x2col, w_eff, bias_p)

        return pl.pallas_call(
            _be_matmul_split_kernel,
            out_shape=jax.ShapeDtypeStruct((M, R_pad, C_out_pad), out_dtype),
            grid=(M, n_row, nk),
            in_specs=[
                pl.BlockSpec((None, TM, tk), lambda m, r, k: (m, r, k)),
                pl.BlockSpec((None, tk, C_out_pad), lambda m, r, k: (m, k, 0)),
                spec((None, 1, C_out_pad), lambda m, r, k: (m, 0, 0), buffers=1),
            ],
            out_specs=pl.BlockSpec((None, TM, C_out_pad),
                                   lambda m, r, k: (m, r, 0)),
            scratch_shapes=[pltpu.VMEM((TM, C_out_pad), jnp.float32)],
            compiler_params=pltpu.CompilerParams(
                dimension_semantics=("parallel", "parallel", "arbitrary"),
                vmem_limit_bytes=vmem_limit),
        )(x2col, w_eff, bias_p)

    try:
        out = _call(True)
    except Exception:
        # pl.Buffered(1) not supported by this Pallas lowering -> default bufs.
        out = _call(False)

    # Drop padding, back to PyTorch NCW convention.
    out = out[:, :R, :C_out].reshape(B, W_out, C_out)
    # TODO(synk): fold this NWC->NCW epilogue into the kernel (in-tile XLU
    # transpose + channel-major output layout) to save one output HBM round trip.
    return jnp.transpose(out, (0, 2, 1))


# ----------------------------- reference -------------------------------------
def _reference_forward(x, alpha, gamma, bias, weight, num_models, stride, padding):
    """Pure-JAX reference replicating the PyTorch forward exactly."""
    B = x.shape[0]
    E = B // num_models
    a = jnp.repeat(alpha, E, axis=0)[:, :, None]
    g = jnp.repeat(gamma, E, axis=0)[:, :, None]
    y = lax.conv_general_dilated(
        x * a, weight, window_strides=(stride,),
        padding=[(padding, padding)],
        dimension_numbers=("NCH", "OIH", "NCH"))
    y = y * g
    if bias is not None:
        y = y + jnp.repeat(bias, E, axis=0)[:, :, None]
    return y


if __name__ == "__main__":
    def make_case(key, num_models, E, C_in, C_out, W, K):
        k_x, k_w, k_a, k_g, k_b = jax.random.split(key, 5)
        B = num_models * E
        x = jax.random.normal(k_x, (B, C_in, W), dtype=jnp.float32)
        fan_in = C_in * K
        bound = 1.0 / math.sqrt(fan_in)
        weight = jax.random.uniform(k_w, (C_out, C_in, K), minval=-bound,
                                    maxval=bound, dtype=jnp.float32)
        alpha = jnp.where(jax.random.bernoulli(k_a, 0.5, (num_models, C_in)),
                          1.0, -1.0).astype(jnp.float32)
        gamma = jnp.where(jax.random.bernoulli(k_g, 0.5, (num_models, C_out)),
                          1.0, -1.0).astype(jnp.float32)
        bias = jax.random.uniform(k_b, (num_models, C_out), minval=-bound,
                                  maxval=bound, dtype=jnp.float32)
        return x, alpha, gamma, bias, weight

    key = jax.random.PRNGKey(0)
    k1, k2 = jax.random.split(key)

    # Case 1: small shapes, single-matmul (no contraction split) path.
    nm, E, C_in, C_out, W, K, stride, padding = 2, 4, 4, 8, 16, 3, 1, 1
    x, alpha, gamma, bias, weight = make_case(k1, nm, E, C_in, C_out, W, K)
    out = batch_ensemble_conv1d(x, alpha, gamma, bias, weight, num_models=nm,
                                stride=stride, padding=padding)
    out = jax.block_until_ready(out)
    ref = _reference_forward(x, alpha, gamma, bias, weight, nm, stride, padding)
    assert out.shape == ref.shape, (out.shape, ref.shape)
    assert jnp.allclose(out, ref, atol=1e-4, rtol=1e-4), \
        float(jnp.max(jnp.abs(out - ref)))

    # Case 2: force the contraction-split path (k grid axis + f32 accumulator),
    # with stride=2, so both kernel bodies are compiled and checked on TPU.
    nm, E, C_in, C_out, W, K, stride, padding = 2, 2, 48, 8, 16, 3, 2, 1
    x, alpha, gamma, bias, weight = make_case(k2, nm, E, C_in, C_out, W, K)
    out = batch_ensemble_conv1d(x, alpha, gamma, bias, weight, num_models=nm,
                                stride=stride, padding=padding, kc_block=128)
    out = jax.block_until_ready(out)
    ref = _reference_forward(x, alpha, gamma, bias, weight, nm, stride, padding)
    assert out.shape == ref.shape, (out.shape, ref.shape)
    assert jnp.allclose(out, ref, atol=1e-4, rtol=1e-4), \
        float(jnp.max(jnp.abs(out - ref)))

    print("KERNEL_OK")
</pallas_src>

<mosaic_0001>
module attributes {stable_mosaic.version = 11 : i64} {
  func.func @_be_matmul_kernel(%arg0: i32, %arg1: i32, %arg2: memref<1x64x16xf32, #tpu.memory_space<vmem>>, %arg3: memref<1x16x128xf32, #tpu.memory_space<vmem>>, %arg4: memref<1x1x128xf32, #tpu.memory_space<vmem>>, %arg5: memref<1x64x128xf32, #tpu.memory_space<vmem>>) attributes {dimension_semantics = [#tpu.dimension_semantics<parallel>, #tpu.dimension_semantics<parallel>], iteration_bounds = array<i64: 2, 1>, scalar_prefetch = 0 : i64, scratch_operands = 0 : i64, tpu.core_type = #tpu.core_type<tc>, window_params = [{transform_indices = @transform_0, window_bounds = array<i64: 1, 64, 16>}, {pipeline_mode = #tpu.pipeline_mode<synchronous>, transform_indices = @transform_1, window_bounds = array<i64: 1, 16, 128>}, {pipeline_mode = #tpu.pipeline_mode<synchronous>, transform_indices = @transform_2, window_bounds = array<i64: 1, 1, 128>}, {transform_indices = @transform_3, window_bounds = array<i64: 1, 64, 128>}]} {
    %c0 = arith.constant 0 : index
    %c0_0 = arith.constant 0 : index
    %c0_1 = arith.constant 0 : index
    %0 = vector.load %arg2[%c0, %c0_0, %c0_1] : memref<1x64x16xf32, #tpu.memory_space<vmem>>, vector<1x64x16xf32>
    %1 = vector.shape_cast %0 : vector<1x64x16xf32> to vector<64x16xf32>
    %c0_2 = arith.constant 0 : index
    %c0_3 = arith.constant 0 : index
    %c0_4 = arith.constant 0 : index
    %2 = vector.load %arg3[%c0_2, %c0_3, %c0_4] : memref<1x16x128xf32, #tpu.memory_space<vmem>>, vector<1x16x128xf32>
    %3 = vector.shape_cast %2 : vector<1x16x128xf32> to vector<16x128xf32>
    %cst = arith.constant dense<0.000000e+00> : vector<64x128xf32>
    %4 = tpu.matmul %1, %3, %cst {dimension_numbers = #tpu.dot_dimension_numbers<[1], [0], [0], [1], [0, 0, 1, 1], [], []>} : vector<64x16xf32>, vector<16x128xf32>, vector<64x128xf32> -> vector<64x128xf32>
    %c0_5 = arith.constant 0 : index
    %c0_6 = arith.constant 0 : index
    %c0_7 = arith.constant 0 : index
    %5 = vector.load %arg4[%c0_5, %c0_6, %c0_7] : memref<1x1x128xf32, #tpu.memory_space<vmem>>, vector<1x1x128xf32>
    %6 = vector.shape_cast %5 : vector<1x1x128xf32> to vector<1x128xf32>
    %7 = vector.broadcast %6 : vector<1x128xf32> to vector<64x128xf32>
    %8 = arith.addf %4, %7 : vector<64x128xf32>
    %c0_8 = arith.constant 0 : index
    %c0_9 = arith.constant 0 : index
    %c0_10 = arith.constant 0 : index
    %9 = vector.load %arg5[%c0_8, %c0_9, %c0_10] : memref<1x64x128xf32, #tpu.memory_space<vmem>>, vector<1x64x128xf32>
    %10 = vector.shape_cast %9 : vector<1x64x128xf32> to vector<64x128xf32>
    %11 = vector.shape_cast %8 : vector<64x128xf32> to vector<1x64x128xf32>
    tpu.vector_store %arg5[%c0_8, %c0_9, %c0_10], %11 {strides = array<i32>} : memref<1x64x128xf32, #tpu.memory_space<vmem>>, vector<1x64x128xf32>,
    return
  }
  func.func @transform_0(%arg0: i32, %arg1: i32) -> (i32, i32, i32) {
    %c0_i32 = arith.constant 0 : i32
    %c0_i32_0 = arith.constant 0 : i32
    return %arg0, %arg1, %c0_i32 : i32, i32, i32
  }
  func.func @transform_1(%arg0: i32, %arg1: i32) -> (i32, i32, i32) {
    %c0_i32 = arith.constant 0 : i32
    %c0_i32_0 = arith.constant 0 : i32
    %c0_i32_1 = arith.constant 0 : i32
    return %arg0, %c0_i32, %c0_i32_0 : i32, i32, i32
  }
  func.func @transform_2(%arg0: i32, %arg1: i32) -> (i32, i32, i32) {
    %c0_i32 = arith.constant 0 : i32
    %c0_i32_0 = arith.constant 0 : i32
    %c0_i32_1 = arith.constant 0 : i32
    return %arg0, %c0_i32, %c0_i32_0 : i32, i32, i32
  }
  func.func @transform_3(%arg0: i32, %arg1: i32) -> (i32, i32, i32) {
    %c0_i32 = arith.constant 0 : i32
    %c0_i32_0 = arith.constant 0 : i32
    return %arg0, %arg1, %c0_i32 : i32, i32, i32
  }
}

module attributes {stable_mosaic.version = 11 : i64} {
  func.func @_be_matmul_kernel(%arg0: i32, %arg1: i32, %arg2: memref<1x64x16xf32, #tpu.memory_space<vmem>>, %arg3: memref<1x16x128xf32, #tpu.memory_space<vmem>>, %arg4: memref<1x1x128xf32, #tpu.memory_space<vmem>>, %arg5: memref<1x64x128xf32, #tpu.memory_space<vmem>>) attributes {dimension_semantics = [#tpu.dimension_semantics<parallel>, #tpu.dimension_semantics<parallel>], iteration_bounds = array<i64: 2, 1>, scalar_prefetch = 0 : i64, scratch_operands = 0 : i64, tpu.core_type = #tpu.core_type<tc>, window_params = [{transform_indices = @transform_0, window_bounds = array<i64: 1, 64, 16>}, {transform_indices = @transform_1, window_bounds = array<i64: 1, 16, 128>}, {transform_indices = @transform_2, window_bounds = array<i64: 1, 1, 128>}, {transform_indices = @transform_3, window_bounds = array<i64: 1, 64, 128>}]} {
    %c0 = arith.constant 0 : index
    %c0_0 = arith.constant 0 : index
    %c0_1 = arith.constant 0 : index
    %0 = vector.load %arg2[%c0, %c0_0, %c0_1] : memref<1x64x16xf32, #tpu.memory_space<vmem>>, vector<1x64x16xf32>
    %1 = vector.shape_cast %0 : vector<1x64x16xf32> to vector<64x16xf32>
    %c0_2 = arith.constant 0 : index
    %c0_3 = arith.constant 0 : index
    %c0_4 = arith.constant 0 : index
    %2 = vector.load %arg3[%c0_2, %c0_3, %c0_4] : memref<1x16x128xf32, #tpu.memory_space<vmem>>, vector<1x16x128xf32>
    %3 = vector.shape_cast %2 : vector<1x16x128xf32> to vector<16x128xf32>
    %cst = arith.constant dense<0.000000e+00> : vector<64x128xf32>
    %4 = tpu.matmul %1, %3, %cst {dimension_numbers = #tpu.dot_dimension_numbers<[1], [0], [0], [1], [0, 0, 1, 1], [], []>} : vector<64x16xf32>, vector<16x128xf32>, vector<64x128xf32> -> vector<64x128xf32>
    %c0_5 = arith.constant 0 : index
    %c0_6 = arith.constant 0 : index
    %c0_7 = arith.constant 0 : index
    %5 = vector.load %arg4[%c0_5, %c0_6, %c0_7] : memref<1x1x128xf32, #tpu.memory_space<vmem>>, vector<1x1x128xf32>
    %6 = vector.shape_cast %5 : vector<1x1x128xf32> to vector<1x128xf32>
    %7 = vector.broadcast %6 : vector<1x128xf32> to vector<64x128xf32>
    %8 = arith.addf %4, %7 : vector<64x128xf32>
    %c0_8 = arith.constant 0 : index
    %c0_9 = arith.constant 0 : index
    %c0_10 = arith.constant 0 : index
    %9 = vector.load %arg5[%c0_8, %c0_9, %c0_10] : memref<1x64x128xf32, #tpu.memory_space<vmem>>, vector<1x64x128xf32>
    %10 = vector.shape_cast %9 : vector<1x64x128xf32> to vector<64x128xf32>
    %11 = vector.shape_cast %8 : vector<64x128xf32> to vector<1x64x128xf32>
    tpu.vector_store %arg5[%c0_8, %c0_9, %c0_10], %11 {strides = array<i32>} : memref<1x64x128xf32, #tpu.memory_space<vmem>>, vector<1x64x128xf32>,
    return
  }
  func.func @transform_0(%arg0: i32, %arg1: i32) -> (i32, i32, i32) {
    %c0_i32 = arith.constant 0 : i32
    %c0_i32_0 = arith.constant 0 : i32
    return %arg0, %arg1, %c0_i32 : i32, i32, i32
  }
  func.func @transform_1(%arg0: i32, %arg1: i32) -> (i32, i32, i32) {
    %c0_i32 = arith.constant 0 : i32
    %c0_i32_0 = arith.constant 0 : i32
    %c0_i32_1 = arith.constant 0 : i32
    return %arg0, %c0_i32, %c0_i32_0 : i32, i32, i32
  }
  func.func @transform_2(%arg0: i32, %arg1: i32) -> (i32, i32, i32) {
    %c0_i32 = arith.constant 0 : i32
    %c0_i32_0 = arith.constant 0 : i32
    %c0_i32_1 = arith.constant 0 : i32
    return %arg0, %c0_i32, %c0_i32_0 : i32, i32, i32
  }
  func.func @transform_3(%arg0: i32, %arg1: i32) -> (i32, i32, i32) {
    %c0_i32 = arith.constant 0 : i32
    %c0_i32_0 = arith.constant 0 : i32
    return %arg0, %arg1, %c0_i32 : i32, i32, i32
  }
}

</mosaic_0001>

<bundles_post_ra>
// kernel: tpu_custom_call.1
= control target key start
LH: loop header
LB: loop body
LE: loop exit
PB: predicated region body
PF: predicated region fallthrough
CT: control target
= control target key end

     0   :  { %8 = vsyncpa [#allocation3], 0  ;;  %s758_s0 = inlined_call_operand.vmem [shape: f32[2,64,16], index: 0, kind: input, shape index: {}]   ;;  %s759_s1 = inlined_call_operand.vmem [shape: f32[2,16,128], index: 1, kind: input, shape index: {}]   ;;  %s760_s2 = inlined_call_operand.vmem [shape: f32[2,1,128], index: 2, kind: input, shape index: {}]   ;;  %s761_s3 = inlined_call_operand.hbm [shape: f32[2,64,128], index: 3, kind: output, shape index: {}]  }
   0x1   :  { %10 = vsyncpa [#allocation3 + $0x1], 0  ;;  %s638_s12 = smov 0   ;;  %s640_s13 = smov 0  }
   0x2   :  { %s642_s14 = smov 0   ;;  %s644_s15 = smov 0  }
   0x3   :  { %s646_s16 = smov 0   ;;  %s648_s17 = smov 0  }
   0x4 LB: > { %s446_s18 = sadd.s32 4294967295, %s614_s17   ;;  %s447_s19 = sadd.s32 4294967294, %s614_s17   ;;  %s614_s17 = sphi %s648_s17, %s16_s17   ;;  %s610_s16 = sphi %s646_s16, %s768_s16   ;;  %s606_s15 = sphi %s644_s15, %s767_s15   ;;  %s602_s14 = sphi %s642_s14, %s766_s14   ;;  %s598_s13 = sphi %s640_s13, %s765_s13   ;;  %s594_s12 = sphi %s638_s12, %s764_s12  }
   0x5   : > { %s28_s20 = sadd.s32 1, %s610_s16  ;;  %s117_s21 = sadd.s32 1, %s602_s14 }
   0x6   : > { %p30_p0 = scmp.ge.s32.totalorder %s28_s20, 2  ;;  %p127_p1 = scmp.ne.s32.totalorder %s602_s14, %s598_s13 }
   0x7   : > { %p128_p2 = scmp.eq.s32.totalorder %s446_s18, 1  ;;  %p133_p3 = scmp.ne.s32.totalorder %s598_s13, %s594_s12 }
   0x8   : > { %s770_s20 = smov (%p30_p0, %s28_s20), 0  ;;  %p134_p5 = scmp.eq.s32.totalorder %s447_s19, 1 }
   0x9   : > { %p678_p4 = por %p128_p2, %p127_p1  ;;  %s112_s23 = ssub.s32 %s610_s16, %s770_s20 }
   0xa   : > { %p450_p6 = scmp.ge.s32.totalorder %s614_s17, 1  ;;  %p115_p7 = scmp.eq.s32.totalorder %s112_s23, 0 }
   0xb   : > { %p685_p8 = por %p134_p5, %p133_p3  ;;  %p179_p9 = scmp.lt.s32.totalorder %s614_s17, 3 }
   0xc   : > { %s691_s25 = scalar_select %p115_p7, %s602_s14, %s117_s21  }
   0xd   : > { %p180_p10 = pnand %p450_p6, %p179_p9 }
   0xe   : > { %p216_p11 = scmp.lt.s32.totalorder (!%p180_p10), %s606_s15, 1  ;;  %s212_s11 = sand.u32 (!%p180_p10), 1, %s598_s13  }
   0xf   : > { %183 = sbr.rel (%p180_p10) target bundleno = 175 (0xaf), region = 32  ;;  %s451_s18 = sshll.u32 (!%p180_p10), %s212_s11, 6 }
  0x10   : > { %s214_s19 = scalar_lea.vmem (!%p180_p10), [#allocation2], %s451_s18  ;;  %s471_s21 = sshll.u32 (!%p180_p10), %s606_s15, 6 }
  0x14   : > { %s695_s26 = scalar_select %p216_p11, %s606_s15, 1  ;;  %vm248_vm0 = vcmask 130048  }
  0x15   : > { %s323_s15 = scalar_lea.sflag [#allocation3], %s212_s11 }
  0x16   : > { %s469_s27 = sshll.u32 %s695_s26, 6  ;;  %s470_s28 = sshll.u32 %s695_s26, 4 }
  0x17   : > { %s223_s4 = scalar_lea.vmem %s758_s0, %s469_s27  ;;  %s229_s7 = scalar_lea.vmem %s759_s1, %s470_s28 }
  0x18   : > { %s232_s10 = scalar_lea.vmem %s760_s2, %s695_s26  ;;  %v243_v0 = vld [vmem:[%s229_s7 + $0x8] sm:$0xff]  ;;  %v242_v1 = vld [vmem:[%s229_s7] sm:$0xff]  ;;  %v240_v3 = vld [vmem:[%s223_s4 + $0x30] sm:$0xff]  ;;  %s336_s27 = scalar_lea.hbm %s761_s3, %s471_s21 }
  0x19   : > { %473 = vmatpush.msra.mxu2 %v243_v0  ;;  %474 = vmatpush.msra.mxu3 %v243_v0  ;;  %v238_v2 = vld [vmem:[%s223_s4 + $0x20] sm:$0xff]  ;;  %v236_v5 = vld [vmem:[%s223_s4 + $0x10] sm:$0xff]  ;;  %v239_v6 = vld [vmem:[%s223_s4 + $0x28] sm:$0xff]  ;;  %s337_s28 = sshll.u32 %s214_s19, 4  ;;  %s339_s29 = sshll.u32 %s336_s27, 4  ;;  %s338_s28 = int_to_ptr.vmem [resolvable:$true] %s337_s28  ;;  %s340_s29 = int_to_ptr.hbm [resolvable:$true] %s339_s29 }
  0x1a   : > { %287 = vmatpush.msra.mxu0 %v243_v0  ;;  %472 = vmatpush.msra.mxu1 %v243_v0  ;;  %v234_v4 = vld [vmem:[%s223_s4] sm:$0xff]  ;;  %v241_v7 = vld [vmem:[%s223_s4 + $0x38] sm:$0xff]  ;;  %v235_v8 = vld [vmem:[%s223_s4 + $0x8] sm:$0xff]  ;;  %s550_s30 = sshra.s32 %s340_s29, 4  ;;  %s556_s7 = scalar_lea.hbm %s761_s3, 128  ;;  %s551_s30 = int_to_ptr.hbm [resolvable:$true] %s550_s30 }
  0x1b   : > { %476 = vmatpush.msra.mxu2 %v242_v1  ;;  %477 = vmatpush.msra.mxu3 %v242_v1  ;;  %v237_v9 = vld [vmem:[%s223_s4 + $0x18] sm:$0xff]  ;;  %v535_v10 = vld [vmem:[%s232_s10] ss:$0 sm:$0xff]  ;;  %s552_s4 = scalar_lea.hbm %s551_s30, 64  ;;  %p557_p1 = scmp.lt.s32.totalorder %s551_s30, %s761_s3 }
  0x1c   : > { %460 = vmatmul.msk.f32.vlgmr.msra.gmra.mxu2 %vm248_vm0, %v238_v2  ;;  %462 = vmatmul.msk.f32.vlgmr.msra.gmra.mxu3 %vm248_vm0, %v240_v3  ;;  %p553_p12 = scmp.ne.s32.totalorder %s551_s30, %s552_s4  ;;  %p558_p2 = scmp.lt.s32.totalorder %s556_s7, %s552_s4 }
  0x1d   : > { %288 = vmatpush.msra.mxu0 %v242_v1  ;;  %475 = vmatpush.msra.mxu1 %v242_v1 }
  0x1e   : > { %456 = vmatmul.msk.f32.vlgmr.msra.gmra.mxu0 %vm248_vm0, %v234_v4  ;;  %458 = vmatmul.msk.f32.vlgmr.msra.gmra.mxu1 %vm248_vm0, %v236_v5  ;;  %p554_p13 = pnand %p553_p12, %p678_p4  ;;  %p559_p3 = por %p558_p2, %p557_p1 }
  0x20   : > { %p555_p0 = pneg %p554_p13 }
  0x22   : > { %p560_p5 = pnand %p559_p3, %p555_p0 }
  0x24   : > { %461 = vmatmul.msk.f32.gmra.mxu2 %vm248_vm0, %v239_v6  ;;  %463 = vmatmul.msk.f32.gmra.mxu3 %vm248_vm0, %v241_v7 }
  0x26   : > { %457 = vmatmul.msk.f32.gmra.mxu0 %vm248_vm0, %v235_v8  ;;  %459 = vmatmul.msk.f32.gmra.mxu1 %vm248_vm0, %v237_v9 }
  0x9b   : > { %v290_v11 = vpop.f32.mrf.mxu0  ;;  %v296_v12 = vpop.f32.mrf.mxu1 }
  0x9c   : > { %v291_v13 = vadd.f32 %v535_v10, %v290_v11  ;;  %v297_v14 = vadd.f32 %v535_v10, %v296_v12 }
  0x9e   : > { %314 = vst [vmem:[%s214_s19] sm:$0xff] %v291_v13 }
  0x9f   : > { %316 = vst [vmem:[%s214_s19 + $0x10] sm:$0xff] %v297_v14  ;;  %v302_v15 = vpop.f32.mrf.mxu2  ;;  %v308_v16 = vpop.f32.mrf.mxu3 }
  0xa0   : > { %v303_v17 = vadd.f32 %v535_v10, %v302_v15  ;;  %v309_v18 = vadd.f32 %v535_v10, %v308_v16 }
  0xa2   : > { %318 = vst [vmem:[%s214_s19 + $0x20] sm:$0xff] %v303_v17 }
  0xa3   : > { %320 = vst [vmem:[%s214_s19 + $0x30] sm:$0xff] %v309_v18  ;;  %v293_v19 = vpop.f32.mrf.mxu0  ;;  %v299_v20 = vpop.f32.mrf.mxu1 }
  0xa4   : > { %v294_v21 = vadd.f32 %v535_v10, %v293_v19  ;;  %v300_v22 = vadd.f32 %v535_v10, %v299_v20 }
  0xa6   : > { %315 = vst [vmem:[%s214_s19 + $0x8] sm:$0xff] %v294_v21 }
  0xa7   : > { %317 = vst [vmem:[%s214_s19 + $0x18] sm:$0xff] %v300_v22  ;;  %v305_v23 = vpop.f32.mrf.mxu2  ;;  %v311_v24 = vpop.f32.mrf.mxu3 }
  0xa8   : > { %v306_v25 = vadd.f32 %v535_v10, %v305_v23  ;;  %v312_v26 = vadd.f32 %v535_v10, %v311_v24 }
  0xaa   : > { %319 = vst [vmem:[%s214_s19 + $0x28] sm:$0xff] %v306_v25 }
  0xab   : > { %321 = vst [vmem:[%s214_s19 + $0x38] sm:$0xff] %v312_v26 }
  0xac   : > { %563 = shalt.err (!%p560_p5)
}
  0xad   : > { %s616_s10 = smov 128   ;;  %s617_s11 = smov 8  }
  0xae   : > { %478 = dma.vmem_to_hbm [thread:$0]  (%p678_p4), %s338_s28, 1024, %s340_s29, %s323_s15, %s616_s10, %s616_s10, %s617_s11  }
  0xaf PF: > { %p484_p6 = scmp.ge.s32.totalorder %s614_s17, 2  ;;  %s354_s18 = sand.u32 1, %s594_s12  }
  0xb0   : > { %s355_s19 = scalar_lea.sflag [#allocation3], %s354_s18 }
  0xb1   : > { %p481_p7 = pnand %p484_p6, %p685_p8 }
  0xb3   : > { %p482_p9 = pneg %p481_p7 }
  0xb5   : > { %589 = dma.done.wait (%p482_p9), %s355_s19, 1024  }
  0xb6   : > { %591 = vsyncadd (%p482_p9), %s355_s19, 4294966272  ;;  %s16_s17 = sadd.s32 1, %s614_s17   ;;  %s764_s12 = smov %s598_s13 }
  0xb7   : > { %p13_p10 = scmp.ge.s32.totalorder %s16_s17, 4   ;;  %s765_s13 = smov %s602_s14 }
  0xb8   : > { %s766_s14 = smov %s691_s25  ;;  %s767_s15 = smov %s610_s16 }
  0xb9   : > { %s768_s16 = smov %s770_s20  ;;  %15 = sbr.rel (!%p13_p10) target bundleno = 4 (0x4), region = 73 }
  0xbe   :  { %361 = vsyncpa [#allocation3], 1 }
  0xbf   :  { %363 = vsyncpa [#allocation3 + $0x1], 1 }

// kernel: tpu_custom_call.1
= control target key start
LH: loop header
LB: loop body
LE: loop exit
PB: predicated region body
PF: predicated region fallthrough
CT: control target
= control target key end

     0   :  { %8 = vsyncpa [#allocation3], 0  ;;  %s752_s0 = inlined_call_operand.vmem [shape: f32[2,64,16], index: 0, kind: input, shape index: {}]   ;;  %s753_s1 = inlined_call_operand.vmem [shape: f32[2,16,128], index: 1, kind: input, shape index: {}]   ;;  %s754_s2 = inlined_call_operand.vmem [shape: f32[2,1,128], index: 2, kind: input, shape index: {}]   ;;  %s755_s3 = inlined_call_operand.hbm [shape: f32[2,64,128], index: 3, kind: output, shape index: {}]  }
   0x1   :  { %10 = vsyncpa [#allocation3 + $0x1], 0  ;;  %s632_s12 = smov 0   ;;  %s634_s13 = smov 0  }
   0x2   :  { %s636_s14 = smov 0   ;;  %s638_s15 = smov 0  }
   0x3   :  { %s640_s16 = smov 0   ;;  %s642_s17 = smov 0  }
   0x4 LB: > { %s440_s18 = sadd.s32 4294967295, %s608_s17   ;;  %s441_s19 = sadd.s32 4294967294, %s608_s17   ;;  %s608_s17 = sphi %s642_s17, %s16_s17   ;;  %s604_s16 = sphi %s640_s16, %s762_s16   ;;  %s600_s15 = sphi %s638_s15, %s761_s15   ;;  %s596_s14 = sphi %s636_s14, %s760_s14   ;;  %s592_s13 = sphi %s634_s13, %s759_s13   ;;  %s588_s12 = sphi %s632_s12, %s758_s12  }
   0x5   : > { %s28_s20 = sadd.s32 1, %s604_s16  ;;  %s117_s21 = sadd.s32 1, %s596_s14 }
   0x6   : > { %p30_p0 = scmp.ge.s32.totalorder %s28_s20, 2  ;;  %p127_p1 = scmp.ne.s32.totalorder %s596_s14, %s592_s13 }
   0x7   : > { %p128_p2 = scmp.eq.s32.totalorder %s440_s18, 1  ;;  %p133_p3 = scmp.ne.s32.totalorder %s592_s13, %s588_s12 }
   0x8   : > { %s764_s20 = smov (%p30_p0, %s28_s20), 0  ;;  %p134_p5 = scmp.eq.s32.totalorder %s441_s19, 1 }
   0x9   : > { %p672_p4 = por %p128_p2, %p127_p1  ;;  %s112_s23 = ssub.s32 %s604_s16, %s764_s20 }
   0xa   : > { %p444_p6 = scmp.ge.s32.totalorder %s608_s17, 1  ;;  %p115_p7 = scmp.eq.s32.totalorder %s112_s23, 0 }
   0xb   : > { %p679_p8 = por %p134_p5, %p133_p3  ;;  %p179_p9 = scmp.lt.s32.totalorder %s608_s17, 3 }
   0xc   : > { %s685_s25 = scalar_select %p115_p7, %s596_s14, %s117_s21  }
   0xd   : > { %p180_p10 = pnand %p444_p6, %p179_p9 }
   0xe   : > { %p216_p11 = scmp.lt.s32.totalorder (!%p180_p10), %s600_s15, 1  ;;  %s212_s11 = sand.u32 (!%p180_p10), 1, %s592_s13  }
   0xf   : > { %183 = sbr.rel (%p180_p10) target bundleno = 175 (0xaf), region = 32  ;;  %s445_s18 = sshll.u32 (!%p180_p10), %s212_s11, 6 }
  0x10   : > { %s214_s19 = scalar_lea.vmem (!%p180_p10), [#allocation2], %s445_s18  ;;  %s465_s21 = sshll.u32 (!%p180_p10), %s600_s15, 6 }
  0x14   : > { %s689_s26 = scalar_select %p216_p11, %s600_s15, 1  ;;  %vm248_vm0 = vcmask 130048  }
  0x15   : > { %s323_s15 = scalar_lea.sflag [#allocation3], %s212_s11 }
  0x16   : > { %s463_s27 = sshll.u32 %s689_s26, 6  ;;  %s464_s28 = sshll.u32 %s689_s26, 4 }
  0x17   : > { %s223_s4 = scalar_lea.vmem %s752_s0, %s463_s27  ;;  %s229_s7 = scalar_lea.vmem %s753_s1, %s464_s28 }
  0x18   : > { %s232_s10 = scalar_lea.vmem %s754_s2, %s689_s26  ;;  %v243_v0 = vld [vmem:[%s229_s7 + $0x8] sm:$0xff]  ;;  %v242_v1 = vld [vmem:[%s229_s7] sm:$0xff]  ;;  %v240_v3 = vld [vmem:[%s223_s4 + $0x30] sm:$0xff]  ;;  %s336_s27 = scalar_lea.hbm %s755_s3, %s465_s21 }
  0x19   : > { %467 = vmatpush.msra.mxu2 %v243_v0  ;;  %468 = vmatpush.msra.mxu3 %v243_v0  ;;  %v238_v2 = vld [vmem:[%s223_s4 + $0x20] sm:$0xff]  ;;  %v236_v5 = vld [vmem:[%s223_s4 + $0x10] sm:$0xff]  ;;  %v239_v6 = vld [vmem:[%s223_s4 + $0x28] sm:$0xff]  ;;  %s337_s28 = sshll.u32 %s214_s19, 4  ;;  %s339_s29 = sshll.u32 %s336_s27, 4  ;;  %s338_s28 = int_to_ptr.vmem [resolvable:$true] %s337_s28  ;;  %s340_s29 = int_to_ptr.hbm [resolvable:$true] %s339_s29 }
  0x1a   : > { %287 = vmatpush.msra.mxu0 %v243_v0  ;;  %466 = vmatpush.msra.mxu1 %v243_v0  ;;  %v234_v4 = vld [vmem:[%s223_s4] sm:$0xff]  ;;  %v241_v7 = vld [vmem:[%s223_s4 + $0x38] sm:$0xff]  ;;  %v235_v8 = vld [vmem:[%s223_s4 + $0x8] sm:$0xff]  ;;  %s544_s30 = sshra.s32 %s340_s29, 4  ;;  %s550_s7 = scalar_lea.hbm %s755_s3, 128  ;;  %s545_s30 = int_to_ptr.hbm [resolvable:$true] %s544_s30 }
  0x1b   : > { %470 = vmatpush.msra.mxu2 %v242_v1  ;;  %471 = vmatpush.msra.mxu3 %v242_v1  ;;  %v237_v9 = vld [vmem:[%s223_s4 + $0x18] sm:$0xff]  ;;  %v529_v10 = vld [vmem:[%s232_s10] ss:$0 sm:$0xff]  ;;  %s546_s4 = scalar_lea.hbm %s545_s30, 64  ;;  %p551_p1 = scmp.lt.s32.totalorder %s545_s30, %s755_s3 }
  0x1c   : > { %454 = vmatmul.msk.f32.vlgmr.msra.gmra.mxu2 %vm248_vm0, %v238_v2  ;;  %456 = vmatmul.msk.f32.vlgmr.msra.gmra.mxu3 %vm248_vm0, %v240_v3  ;;  %p547_p12 = scmp.ne.s32.totalorder %s545_s30, %s546_s4  ;;  %p552_p2 = scmp.lt.s32.totalorder %s550_s7, %s546_s4 }
  0x1d   : > { %288 = vmatpush.msra.mxu0 %v242_v1  ;;  %469 = vmatpush.msra.mxu1 %v242_v1 }
  0x1e   : > { %450 = vmatmul.msk.f32.vlgmr.msra.gmra.mxu0 %vm248_vm0, %v234_v4  ;;  %452 = vmatmul.msk.f32.vlgmr.msra.gmra.mxu1 %vm248_vm0, %v236_v5  ;;  %p548_p13 = pnand %p547_p12, %p672_p4  ;;  %p553_p3 = por %p552_p2, %p551_p1 }
  0x20   : > { %p549_p0 = pneg %p548_p13 }
  0x22   : > { %p554_p5 = pnand %p553_p3, %p549_p0 }
  0x24   : > { %455 = vmatmul.msk.f32.gmra.mxu2 %vm248_vm0, %v239_v6  ;;  %457 = vmatmul.msk.f32.gmra.mxu3 %vm248_vm0, %v241_v7 }
  0x26   : > { %451 = vmatmul.msk.f32.gmra.mxu0 %vm248_vm0, %v235_v8  ;;  %453 = vmatmul.msk.f32.gmra.mxu1 %vm248_vm0, %v237_v9 }
  0x9b   : > { %v290_v11 = vpop.f32.mrf.mxu0  ;;  %v296_v12 = vpop.f32.mrf.mxu1 }
  0x9c   : > { %v291_v13 = vadd.f32 %v529_v10, %v290_v11  ;;  %v297_v14 = vadd.f32 %v529_v10, %v296_v12 }
  0x9e   : > { %314 = vst [vmem:[%s214_s19] sm:$0xff] %v291_v13 }
  0x9f   : > { %316 = vst [vmem:[%s214_s19 + $0x10] sm:$0xff] %v297_v14  ;;  %v302_v15 = vpop.f32.mrf.mxu2  ;;  %v308_v16 = vpop.f32.mrf.mxu3 }
  0xa0   : > { %v303_v17 = vadd.f32 %v529_v10, %v302_v15  ;;  %v309_v18 = vadd.f32 %v529_v10, %v308_v16 }
  0xa2   : > { %318 = vst [vmem:[%s214_s19 + $0x20] sm:$0xff] %v303_v17 }
  0xa3   : > { %320 = vst [vmem:[%s214_s19 + $0x30] sm:$0xff] %v309_v18  ;;  %v293_v19 = vpop.f32.mrf.mxu0  ;;  %v299_v20 = vpop.f32.mrf.mxu1 }
  0xa4   : > { %v294_v21 = vadd.f32 %v529_v10, %v293_v19  ;;  %v300_v22 = vadd.f32 %v529_v10, %v299_v20 }
  0xa6   : > { %315 = vst [vmem:[%s214_s19 + $0x8] sm:$0xff] %v294_v21 }
  0xa7   : > { %317 = vst [vmem:[%s214_s19 + $0x18] sm:$0xff] %v300_v22  ;;  %v305_v23 = vpop.f32.mrf.mxu2  ;;  %v311_v24 = vpop.f32.mrf.mxu3 }
  0xa8   : > { %v306_v25 = vadd.f32 %v529_v10, %v305_v23  ;;  %v312_v26 = vadd.f32 %v529_v10, %v311_v24 }
  0xaa   : > { %319 = vst [vmem:[%s214_s19 + $0x28] sm:$0xff] %v306_v25 }
  0xab   : > { %321 = vst [vmem:[%s214_s19 + $0x38] sm:$0xff] %v312_v26 }
  0xac   : > { %557 = shalt.err (!%p554_p5)
}
  0xad   : > { %s610_s10 = smov 128   ;;  %s611_s11 = smov 8  }
  0xae   : > { %472 = dma.vmem_to_hbm [thread:$0]  (%p672_p4), %s338_s28, 1024, %s340_s29, %s323_s15, %s610_s10, %s610_s10, %s611_s11  }
  0xaf PF: > { %p478_p6 = scmp.ge.s32.totalorder %s608_s17, 2  ;;  %s354_s18 = sand.u32 1, %s588_s12  }
  0xb0   : > { %s355_s19 = scalar_lea.sflag [#allocation3], %s354_s18 }
  0xb1   : > { %p475_p7 = pnand %p478_p6, %p679_p8 }
  0xb3   : > { %p476_p9 = pneg %p475_p7 }
  0xb5   : > { %583 = dma.done.wait (%p476_p9), %s355_s19, 1024  }
  0xb6   : > { %585 = vsyncadd (%p476_p9), %s355_s19, 4294966272  ;;  %s16_s17 = sadd.s32 1, %s608_s17   ;;  %s758_s12 = smov %s592_s13 }
  0xb7   : > { %p13_p10 = scmp.ge.s32.totalorder %s16_s17, 4   ;;  %s759_s13 = smov %s596_s14 }
  0xb8   : > { %s760_s14 = smov %s685_s25  ;;  %s761_s15 = smov %s604_s16 }
  0xb9   : > { %s762_s16 = smov %s764_s20  ;;  %15 = sbr.rel (!%p13_p10) target bundleno = 4 (0x4), region = 73 }
  0xbe   :  { %361 = vsyncpa [#allocation3], 1 }
  0xbf   :  { %363 = vsyncpa [#allocation3 + $0x1], 1 }

</bundles_post_ra>
